<compile_context>
chip_gen: v6e
topology: v6e:2x2x1
jax: 0.10.0
libtpu: 0.0.40
codegen_flags: <defaults>
</compile_context>

<pallas_src>
import functools

import jax
import jax.numpy as jnp
from jax.experimental import pallas as pl
from jax.experimental.pallas import tpu as pltpu

HIDDEN_DIM = 256      # matches `hidden_dim = 256` in Net.__init__
EMBED_DIM = 128       # stand-in for self.embedding.config.hidden_size
OUTPUT_DIM = 8        # output_dim != 1 -> forward takes the `.squeeze(-1)` branch
OUT_PAD = 128         # fc1 output lane-padded to a full 128-lane vreg width
TB_MAX = 512          # max batch rows per grid step


def mlp_head_kernel(x_ref,              # [TB, E]  bf16  (pipelined activation tile)
                    w0_ref, b0_ref,     # [E, H]   bf16, [1, H]  f32
                    w1_ref, b1_ref,     # [H, OP]  bf16, [1, OP] f32 (lane-padded)
                    o_ref):             # [TB, OP] f32 output tile (lane-dense store)
    # fc0 -> relu -> fc1: bf16 MXU inputs, f32 accumulation + f32 elementwise.
    h = jnp.dot(x_ref[...], w0_ref[...], preferred_element_type=jnp.float32)
    h = jnp.maximum(h + b0_ref[...], 0.0)
    y = jnp.dot(h.astype(jnp.bfloat16), w1_ref[...],
                preferred_element_type=jnp.float32)
    o_ref[...] = y + b1_ref[...]


def _choose_tb(batch):
    """Batch tile size.

    - batch <= 8: one tile equal to the full array dim (valid block shape).
    - otherwise: aim for >= 2 tiles (keeps both v7x TensorCores fed under
      dimension_semantics=('parallel',)), round rows up to a sublane multiple
      of 8, and cap at TB_MAX to bound per-tile VMEM while amortizing the
      ~0.35 us per-grid-step overhead.
    """
    if batch <= 8:
        return batch
    half = -(-batch // 2)                  # ceil(batch / 2)
    tb = ((half + 7) // 8) * 8             # round up to multiple of 8 sublanes
    return min(tb, TB_MAX)


@functools.partial(jax.jit, static_argnames=("output_dim",))
def net_forward(input_ids, attention_mask, params, *, output_dim=OUTPUT_DIM):
    """JAX/Pallas port of Net.forward (eval mode: dropout is identity)."""
    del attention_mask  # consumed only by the (replaced) transformer backbone
    # TODO(synk): the HuggingFace AutoModel transformer backbone has no clean
    # Pallas equivalent; it is replaced by a deterministic token-embedding
    # lookup producing the [CLS] (position-0) hidden state, i.e. `[0][:, 0]`.
    cls_ids = input_ids[:, 0].astype(jnp.int32)                    # [B]

    # Wrapper-side gather: one XLA gather on a tiny table, producing a normal
    # pipelined kernel input (replaces TB tiny per-row HBM DMAs per tile).
    x = jnp.take(params["embed_table"], cls_ids, axis=0)           # [B, E] bf16

    B, E = x.shape
    H = params["w0"].shape[1]
    OP = params["w1"].shape[1]                                     # lane-padded

    TB = _choose_tb(B)
    num_tiles = -(-B // TB)
    Bp = num_tiles * TB
    if Bp != B:
        # Pad only the gathered activations; padded rows are zeros and their
        # outputs are sliced off below.
        x = jnp.pad(x, ((0, Bp - B), (0, 0)))

    out = pl.pallas_call(
        mlp_head_kernel,
        out_shape=jax.ShapeDtypeStruct((Bp, OP), jnp.float32),
        grid_spec=pltpu.PrefetchScalarGridSpec(
            num_scalar_prefetch=0,
            grid=(num_tiles,),
            in_specs=[
                pl.BlockSpec((TB, E), lambda i: (i, 0)),   # x tile (pipelined)
                pl.BlockSpec((E, H), lambda i: (0, 0)),    # w0, VMEM resident
                pl.BlockSpec((1, H), lambda i: (0, 0)),    # b0
                pl.BlockSpec((H, OP), lambda i: (0, 0)),   # w1 (lane-padded)
                pl.BlockSpec((1, OP), lambda i: (0, 0)),   # b1 (lane-padded)
            ],
            out_specs=pl.BlockSpec((TB, OP), lambda i: (i, 0)),
        ),
        compiler_params=pltpu.CompilerParams(
            dimension_semantics=("parallel",),   # batch tiles shard across TCs
        ),
    )(x, params["w0"], params["b0"], params["w1"], params["b1"])

    out = out[:B, :output_dim]                   # drop row padding + lane padding
    if output_dim == 1:
        return out                               # fc1(x) -> [B, 1]
    # `.squeeze(-1)` branch; no-op unless the last dim happens to be 1.
    return jnp.squeeze(out, axis=-1) if out.shape[-1] == 1 else out


def init_params(key, vocab_size=100, embed_dim=EMBED_DIM,
                hidden_dim=HIDDEN_DIM, output_dim=OUTPUT_DIM):
    k_emb, k_w0, k_w1 = jax.random.split(key, 3)
    # reset_parameters(): weights ~ N(0, 0.02), biases zeroed.
    # Matmul weights stored [in, out] (transposed vs. PyTorch Linear) in bf16;
    # fc1 weight/bias lane-padded to OUT_PAD columns (extra columns are zero).
    w1 = jax.random.normal(k_w1, (hidden_dim, output_dim), jnp.float32) * 0.02
    w1_padded = jnp.zeros((hidden_dim, OUT_PAD), jnp.float32)
    w1_padded = w1_padded.at[:, :output_dim].set(w1)
    return {
        "embed_table": (jax.random.normal(k_emb, (vocab_size, embed_dim),
                                          jnp.float32) * 0.02).astype(jnp.bfloat16),
        "w0": (jax.random.normal(k_w0, (embed_dim, hidden_dim),
                                 jnp.float32) * 0.02).astype(jnp.bfloat16),
        "b0": jnp.zeros((1, hidden_dim), jnp.float32),
        "w1": w1_padded.astype(jnp.bfloat16),
        "b1": jnp.zeros((1, OUT_PAD), jnp.float32),
    }


if __name__ == "__main__":
    key = jax.random.PRNGKey(0)
    k_params, k_ids = jax.random.split(key)

    B, S = 2, 8
    params = init_params(k_params)
    input_ids = jax.random.randint(k_ids, (B, S), 0, 100, dtype=jnp.int32)
    attention_mask = jnp.ones((B, S), dtype=jnp.int32)

    out = net_forward(input_ids, attention_mask, params)
    out = jax.block_until_ready(out)

    # Pure-JAX reference of the fused path (same bf16-in / f32-acc recipe).
    x = params["embed_table"][input_ids[:, 0]]                       # bf16 [B, E]
    h = jnp.dot(x, params["w0"], preferred_element_type=jnp.float32) + params["b0"]
    h = jnp.maximum(h, 0.0)
    ref_full = jnp.dot(h.astype(jnp.bfloat16), params["w1"],
                       preferred_element_type=jnp.float32) + params["b1"]
    ref = ref_full[:, :OUTPUT_DIM]

    assert out.shape == (B, OUTPUT_DIM), out.shape
    assert jnp.allclose(out, ref, atol=2e-5, rtol=1e-3), \
        float(jnp.max(jnp.abs(out - ref)))

    print("KERNEL_OK")
</pallas_src>

<mosaic_0001>
module attributes {stable_mosaic.version = 11 : i64} {
  func.func @mlp_head_kernel(%arg0: i32, %arg1: memref<2x128xbf16, #tpu.memory_space<vmem>>, %arg2: memref<128x256xbf16, #tpu.memory_space<vmem>>, %arg3: memref<1x256xf32, #tpu.memory_space<vmem>>, %arg4: memref<256x128xbf16, #tpu.memory_space<vmem>>, %arg5: memref<1x128xf32, #tpu.memory_space<vmem>>, %arg6: memref<2x128xf32, #tpu.memory_space<vmem>>) attributes {dimension_semantics = [#tpu.dimension_semantics<parallel>], iteration_bounds = array<i64: 1>, scalar_prefetch = 0 : i64, scratch_operands = 0 : i64, tpu.core_type = #tpu.core_type<tc>, window_params = [{transform_indices = @transform_0, window_bounds = array<i64: 2, 128>}, {pipeline_mode = #tpu.pipeline_mode<synchronous>, transform_indices = @transform_1, window_bounds = array<i64: 128, 256>}, {pipeline_mode = #tpu.pipeline_mode<synchronous>, transform_indices = @transform_2, window_bounds = array<i64: 1, 256>}, {pipeline_mode = #tpu.pipeline_mode<synchronous>, transform_indices = @transform_3, window_bounds = array<i64: 256, 128>}, {pipeline_mode = #tpu.pipeline_mode<synchronous>, transform_indices = @transform_4, window_bounds = array<i64: 1, 128>}, {transform_indices = @transform_5, window_bounds = array<i64: 2, 128>}]} {
    %c0 = arith.constant 0 : index
    %c0_0 = arith.constant 0 : index
    %0 = vector.load %arg1[%c0, %c0_0] : memref<2x128xbf16, #tpu.memory_space<vmem>>, vector<2x128xbf16>
    %c0_1 = arith.constant 0 : index
    %c0_2 = arith.constant 0 : index
    %1 = vector.load %arg2[%c0_1, %c0_2] : memref<128x256xbf16, #tpu.memory_space<vmem>>, vector<128x256xbf16>
    %cst = arith.constant dense<0.000000e+00> : vector<2x256xf32>
    %2 = tpu.matmul %0, %1, %cst {dimension_numbers = #tpu.dot_dimension_numbers<[1], [0], [0], [1], [0, 0, 1, 1], [], []>} : vector<2x128xbf16>, vector<128x256xbf16>, vector<2x256xf32> -> vector<2x256xf32>
    %c0_3 = arith.constant 0 : index
    %c0_4 = arith.constant 0 : index
    %3 = vector.load %arg3[%c0_3, %c0_4] : memref<1x256xf32, #tpu.memory_space<vmem>>, vector<1x256xf32>
    %4 = vector.broadcast %3 : vector<1x256xf32> to vector<2x256xf32>
    %5 = arith.addf %2, %4 : vector<2x256xf32>
    %cst_5 = arith.constant 0.000000e+00 : f32
    %6 = vector.broadcast %cst_5 : f32 to vector<2x256xf32>
    %7 = arith.maximumf %5, %6 : vector<2x256xf32>
    %8 = arith.truncf %7 : vector<2x256xf32> to vector<2x256xbf16>
    %c0_6 = arith.constant 0 : index
    %c0_7 = arith.constant 0 : index
    %9 = vector.load %arg4[%c0_6, %c0_7] : memref<256x128xbf16, #tpu.memory_space<vmem>>, vector<256x128xbf16>
    %cst_8 = arith.constant dense<0.000000e+00> : vector<2x128xf32>
    %10 = tpu.matmul %8, %9, %cst_8 {dimension_numbers = #tpu.dot_dimension_numbers<[1], [0], [0], [1], [0, 0, 1, 1], [], []>} : vector<2x256xbf16>, vector<256x128xbf16>, vector<2x128xf32> -> vector<2x128xf32>
    %c0_9 = arith.constant 0 : index
    %c0_10 = arith.constant 0 : index
    %11 = vector.load %arg5[%c0_9, %c0_10] : memref<1x128xf32, #tpu.memory_space<vmem>>, vector<1x128xf32>
    %12 = vector.broadcast %11 : vector<1x128xf32> to vector<2x128xf32>
    %13 = arith.addf %10, %12 : vector<2x128xf32>
    %c0_11 = arith.constant 0 : index
    %c0_12 = arith.constant 0 : index
    %14 = vector.load %arg6[%c0_11, %c0_12] : memref<2x128xf32, #tpu.memory_space<vmem>>, vector<2x128xf32>
    tpu.vector_store %arg6[%c0_11, %c0_12], %13 {strides = array<i32>} : memref<2x128xf32, #tpu.memory_space<vmem>>, vector<2x128xf32>,
    return
  }
  func.func @transform_0(%arg0: i32) -> (i32, i32) {
    %c0_i32 = arith.constant 0 : i32
    %c0_i32_0 = arith.constant 0 : i32
    return %arg0, %c0_i32 : i32, i32
  }
  func.func @transform_1(%arg0: i32) -> (i32, i32) {
    %c0_i32 = arith.constant 0 : i32
    %c0_i32_0 = arith.constant 0 : i32
    %c0_i32_1 = arith.constant 0 : i32
    return %c0_i32, %c0_i32_0 : i32, i32
  }
  func.func @transform_2(%arg0: i32) -> (i32, i32) {
    %c0_i32 = arith.constant 0 : i32
    %c0_i32_0 = arith.constant 0 : i32
    %c0_i32_1 = arith.constant 0 : i32
    return %c0_i32, %c0_i32_0 : i32, i32
  }
  func.func @transform_3(%arg0: i32) -> (i32, i32) {
    %c0_i32 = arith.constant 0 : i32
    %c0_i32_0 = arith.constant 0 : i32
    %c0_i32_1 = arith.constant 0 : i32
    return %c0_i32, %c0_i32_0 : i32, i32
  }
  func.func @transform_4(%arg0: i32) -> (i32, i32) {
    %c0_i32 = arith.constant 0 : i32
    %c0_i32_0 = arith.constant 0 : i32
    %c0_i32_1 = arith.constant 0 : i32
    return %c0_i32, %c0_i32_0 : i32, i32
  }
  func.func @transform_5(%arg0: i32) -> (i32, i32) {
    %c0_i32 = arith.constant 0 : i32
    %c0_i32_0 = arith.constant 0 : i32
    return %arg0, %c0_i32 : i32, i32
  }
}

</mosaic_0001>

<bundles_post_ra>
// kernel: net_forward.1
= control target key start
LH: loop header
LB: loop body
LE: loop exit
PB: predicated region body
PF: predicated region fallthrough
CT: control target
= control target key end

     0   :  { %10 = vsyncpa [#allocation3], 0  ;;  %s621_s0 = inlined_call_operand.vmem [shape: bf16[2,128], index: 0, kind: input, shape index: {}]   ;;  %s622_s1 = inlined_call_operand.hbm [shape: bf16[128,256], index: 1, kind: input, shape index: {}]   ;;  %s623_s2 = inlined_call_operand.vmem [shape: f32[1,256], index: 2, kind: input, shape index: {}]   ;;  %s624_s3 = inlined_call_operand.hbm [shape: bf16[256,128], index: 3, kind: input, shape index: {}]   ;;  %s625_s4 = inlined_call_operand.vmem [shape: f32[1,128], index: 4, kind: input, shape index: {}]   ;;  %s626_s5 = inlined_call_operand.hbm [shape: f32[2,128], index: 5, kind: output, shape index: {}]  }
   0x1   :  { %11 = vsyncpa [#allocation6], 0 }
   0x2   :  { %12 = vsyncpa [#allocation4], 0  ;;  %s565_s18 = smov [#allocation2]  }
   0x3   :  { %s20_s19 = sshll.u32 %s565_s18, 4  ;;  %s21_s19 = int_to_ptr.vmem [resolvable:$true] %s20_s19 }
   0x4   :  { %s507_s20 = scalar_lea.vmem %s21_s19, 2048  ;;  %p512_p1 = scmp.lt.s32.totalorder %s21_s19, %s21_s19 }
   0x5   :  { %p508_p0 = scmp.ne.s32.totalorder %s21_s19, %s507_s20  ;;  %p513_p2 = scmp.lt.s32.totalorder %s507_s20, %s507_s20 }
   0x7   :  { %p514_p3 = por %p513_p2, %p512_p1 }
   0x9   :  { %p515_p4 = pnand %p514_p3, %p508_p0 }
   0xb   :  { %518 = shalt.err (!%p515_p4)
}
   0xc   :  { %s566_s21 = smov 128   ;;  %s567_s22 = smov 8  }
   0xd   :  { %26 = dma.hbm_to_vmem [thread:$0]  %s622_s1, 2048, %s21_s19, [#allocation3], %s566_s21, %s566_s21, %s567_s22  }
   0xe   :  { %s568_s25 = smov [#allocation5]  }
   0xf   :  { %s34_s26 = sshll.u32 %s568_s25, 4  ;;  %s35_s26 = int_to_ptr.vmem [resolvable:$true] %s34_s26 }
  0x10   :  { %s527_s27 = scalar_lea.vmem %s35_s26, 2048  ;;  %p532_p6 = scmp.lt.s32.totalorder %s35_s26, %s35_s26 }
  0x11   :  { %p528_p5 = scmp.ne.s32.totalorder %s35_s26, %s527_s27  ;;  %p533_p7 = scmp.lt.s32.totalorder %s527_s27, %s527_s27 }
  0x13   :  { %p534_p8 = por %p533_p7, %p532_p6 }
  0x15   :  { %p535_p9 = pnand %p534_p8, %p528_p5 }
  0x17   :  { %538 = shalt.err (!%p535_p9)
}
  0x18   :  { %s569_s28 = smov 64   ;;  %s570_s29 = smov 4  }
  0x19   :  { %40 = dma.hbm_to_vmem [thread:$0]  %s624_s3, 2048, %s35_s26, [#allocation6], %s569_s28, %s569_s28, %s570_s29  }
  0x1a   :  { %559 = dma.done.wait [#allocation3], 2048  }
  0x1b   :  { %560 = vsyncadd [#allocation3], 4294965248 }
  0x1c   :  { %561 = dma.done.wait [#allocation6], 2048  }
  0x1d   :  { %562 = vsyncadd [#allocation6], 4294965248  ;;  %v571_v0 = vmov 0   ;;  %v459_v1 = vld [vmem:[#allocation2 + $0x74] ss:$8 sps:$4 sm:$0xff]   ;;  %v487_v15 = vld [vmem:[#allocation5 + $0x68] sm:$0xff]   ;;  %v69_v34 = vlaneseq }
  0x1e   :  { %191 = vmatprep.mubr.bf16.mxu0 %v571_v0  ;;  %v461_v2 = vld [vmem:[#allocation2 + $0x70] ss:$8 sps:$4 sm:$0xff]   ;;  %159 = vmatprep.subr.bf16.mxu0 %v459_v1  ;;  %v462_v3 = vld [vmem:[#allocation2 + $0x64] ss:$8 sps:$4 sm:$0xff]   ;;  %v464_v4 = vld [vmem:[#allocation2 + $0x60] ss:$8 sps:$4 sm:$0xff]  }
  0x1f   :  { %160 = vmatpush1.bf16.msra.mxu0 %v461_v2  ;;  %v465_v5 = vld [vmem:[#allocation2 + $0x54] ss:$8 sps:$4 sm:$0xff]   ;;  %v467_v6 = vld [vmem:[#allocation2 + $0x50] ss:$8 sps:$4 sm:$0xff]   ;;  %v468_v7 = vld [vmem:[#allocation2 + $0x44] ss:$8 sps:$4 sm:$0xff]  }
  0x20   :  { %161 = vmatprep.subr.bf16.mxu0 %v462_v3  ;;  %v470_v8 = vld [vmem:[#allocation2 + $0x40] ss:$8 sps:$4 sm:$0xff]   ;;  %v471_v9 = vld [vmem:[#allocation2 + $0x34] ss:$8 sps:$4 sm:$0xff]   ;;  %v473_v12 = vld [vmem:[#allocation2 + $0x30] ss:$8 sps:$4 sm:$0xff]  }
  0x21   :  { %v483_v10 = vld [vmem:[#allocation5 + $0x78] sm:$0xff]   ;;  %v485_v13 = vld [vmem:[#allocation5 + $0x70] sm:$0xff]   ;;  %v474_v16 = vld [vmem:[#allocation2 + $0x24] ss:$8 sps:$4 sm:$0xff]   ;;  %v70_v35 = vshrl.u32 %v69_v34, 7 }
  0x22   :  { %v484_v11 = vld [vmem:[#allocation5 + $0x38] sm:$0xff]   ;;  %429 = vmatprep.subr.bf16.mxu1 %v483_v10  ;;  %v486_v14 = vld [vmem:[#allocation5 + $0x30] sm:$0xff]   ;;  %v476_v17 = vld [vmem:[#allocation2 + $0x20] ss:$8 sps:$4 sm:$0xff]  }
  0x23   :  { %162 = vmatpush1.bf16.msra.mxu0 %v464_v4  ;;  %430 = vmatpush3.bf16.msra.mxu1 %v484_v11  ;;  %v488_v18 = vld [vmem:[#allocation5 + $0x28] sm:$0xff]   ;;  %v489_v19 = vld [vmem:[#allocation5 + $0x60] sm:$0xff]   ;;  %v477_v20 = vld [vmem:[#allocation2 + $0x14] ss:$8 sps:$4 sm:$0xff]   ;;  %v71_v36 = vsub.s32 0, %v70_v35  ;;  %v75_v38 = vsub.s32 1, %v70_v35 }
  0x24   :  { %163 = vmatprep.subr.bf16.mxu0 %v465_v5  ;;  %431 = vmatprep.subr.bf16.mxu1 %v485_v13  ;;  %v479_v21 = vld [vmem:[#allocation2 + $0x10] ss:$8 sps:$4 sm:$0xff]   ;;  %v480_v22 = vld [vmem:[#allocation2 + $0x4] ss:$8 sps:$4 sm:$0xff]   ;;  %v482_v26 = vld [vmem:[#allocation2] ss:$8 sps:$4 sm:$0xff]  }
  0x25   :  { %v490_v23 = vld [vmem:[#allocation5 + $0x20] sm:$0xff]   ;;  %v491_v24 = vld [vmem:[#allocation5 + $0x58] sm:$0xff]   ;;  %v493_v27 = vld [vmem:[#allocation5 + $0x50] sm:$0xff]  }
  0x26   :  { %v492_v25 = vld [vmem:[#allocation5 + $0x18] sm:$0xff]   ;;  %v494_v28 = vld [vmem:[#allocation5 + $0x10] sm:$0xff]   ;;  %v50_v29 = vld [vmem:[%s621_s0] sm:$0x1] }
  0x27   :  { %164 = vmatpush1.bf16.msra.mxu0 %v467_v6  ;;  %432 = vmatpush3.bf16.msra.mxu1 %v486_v14  ;;  %v495_v30 = vld [vmem:[#allocation5 + $0x48] sm:$0xff]   ;;  %v497_v32 = vld [vmem:[#allocation5 + $0x40] sm:$0xff]  }
  0x28   :  { %165 = vmatprep.subr.bf16.mxu0 %v468_v7  ;;  %433 = vmatprep.subr.bf16.mxu1 %v487_v15  ;;  %v496_v31 = vld [vmem:[#allocation5 + $0x8] sm:$0xff]   ;;  %v498_v33 = vld [vmem:[#allocation5] sm:$0xff]  }
  0x29   :  { %v67_v37 = vld [vmem:[%s623_s2] sm:$0x3]  ;;  %s572_s2 = smov [#allocation7]  }
  0x2a   :  { %v72_v39 = vrot.slane %v67_v37, %v71_v36  ;;  %v76_v40 = vrot.slane %v67_v37, %v75_v38  ;;  %v412_v52 = vld [vmem:[%s625_s4] ss:$0 sm:$0xff]  ;;  %s386_s10 = sshll.u32 %s572_s2, 4  ;;  %s387_s10 = int_to_ptr.vmem [resolvable:$true] %s386_s10 }
  0x2b   :  { %166 = vmatpush1.bf16.msra.mxu0 %v470_v8  ;;  %434 = vmatpush3.bf16.msra.mxu1 %v488_v18  ;;  %s539_s11 = scalar_lea.vmem %s387_s10, 32  ;;  %p544_p11 = scmp.lt.s32.totalorder %s387_s10, %s387_s10 }
  0x2c   :  { %167 = vmatprep.subr.bf16.mxu0 %v471_v9  ;;  %435 = vmatprep.subr.bf16.mxu1 %v489_v19  ;;  %p540_p10 = scmp.ne.s32.totalorder %s387_s10, %s539_s11  ;;  %p545_p12 = scmp.lt.s32.totalorder %s539_s11, %s539_s11 }
  0x2e   :  { %p546_p13 = por %p545_p12, %p544_p11 }
  0x2f   :  { %168 = vmatpush1.bf16.msra.mxu0 %v473_v12  ;;  %436 = vmatpush3.bf16.msra.mxu1 %v490_v23 }
  0x30   :  { %169 = vmatprep.subr.bf16.mxu0 %v474_v16  ;;  %437 = vmatprep.subr.bf16.mxu1 %v491_v24  ;;  %p547_p0 = pnand %p546_p13, %p540_p10 }
  0x33   :  { %170 = vmatpush1.bf16.msra.mxu0 %v476_v17  ;;  %438 = vmatpush3.bf16.msra.mxu1 %v492_v25 }
  0x34   :  { %171 = vmatprep.subr.bf16.mxu0 %v477_v20  ;;  %439 = vmatprep.subr.bf16.mxu1 %v493_v27 }
  0x37   :  { %172 = vmatpush1.bf16.msra.mxu0 %v479_v21  ;;  %440 = vmatpush3.bf16.msra.mxu1 %v494_v28 }
  0x38   :  { %173 = vmatprep.subr.bf16.mxu0 %v480_v22  ;;  %441 = vmatprep.subr.bf16.mxu1 %v495_v30 }
  0x3b   :  { %174 = vmatpush1.bf16.msra.mxu0 %v482_v26  ;;  %442 = vmatpush3.bf16.msra.mxu1 %v496_v31 }
  0x3c   :  { %443 = vmatprep.subr.bf16.mxu1 %v497_v32 }
  0x3e   :  { %192 = vmatmul.mubr.bf16.vlgmr.msra.gmra.mxu0 %v50_v29 }
  0x3f   :  { %444 = vmatpush3.bf16.msra.mxu1 %v498_v33 }
  0xfe   :  { %v193_v41 = vpop.f32.mrf.mxu0 }
  0xff   :  { %v194_v42 = vadd.f32 %v193_v41, %v72_v39 }
 0x100   :  { %v195_v43 = vpop.f32.mrf.mxu0 }
 0x101   :  { %v196_v44 = vadd.f32 %v195_v43, %v76_v40  ;;  %v200_v45 = vmax.f32 %v194_v42, 0.0 }
 0x102   :  { %v197_v46 = vpop.f32.mrf.mxu0 }
 0x103   :  { %v201_v47 = vmax.f32 %v196_v44, 0.0  ;;  %v202_v50 = vpack.c.bf16 %v200_v45, %v200_v45 }
 0x104   :  { %v198_v48 = vpop.f32.mrf.mxu0 }
 0x105   :  { %v203_v49 = vpack.c.bf16 %v201_v47, %v201_v47 }
 0x107   :  { %371 = vmatprep.mubr.bf16.mxu1 %v203_v49 }
 0x108   :  { %372 = vmatmul.mubr.bf16.vlgmr.msra.gmra.mxu1 %v202_v50 }
 0x1c8   :  { %v445_v51 = vpop.f32.mrf.mxu1 }
 0x1ca   :  { %v446_v53 = vpop.f32.mrf.mxu1 }
 0x1cb   :  { %v447_v54 = vadd.f32 %v446_v53, %v445_v51 }
 0x1cc   :  { %v448_v55 = vpop.f32.mrf.mxu1 }
 0x1cd   :  { %v374_v56 = vadd.f32 %v447_v54, %v412_v52 }
 0x1ce   :  { %v449_v57 = vpop.f32.mrf.mxu1 }
 0x1cf   :  { %379 = vst [vmem:[#allocation7] sm:$0x3] %v374_v56 }
 0x1d0   :  { %550 = shalt.err (!%p547_p0)
}
 0x1d1   :  { %389 = dma.vmem_to_hbm [thread:$0]  %s387_s10, 32, %s626_s5, [#allocation4]  }
 0x1d2   :  { %563 = dma.done.wait [#allocation4], 32  }
 0x1d3   :  { %564 = vsyncadd [#allocation4], 4294967264 }
 0x1d4   :  { %393 = vsyncpa [#allocation3], 1 }
 0x1d5   :  { %394 = vsyncpa [#allocation6], 1 }
 0x1d6   :  { %395 = vsyncpa [#allocation4], 1 }

</bundles_post_ra>
